<compile_context>
chip_gen: v5e
topology: v5e:2x2
jax: 0.10.0
libtpu: 0.0.40
codegen_flags: <defaults>
</compile_context>

<pallas_src>
import functools

import numpy as np
import jax
import jax.numpy as jnp
from jax import lax
from jax.experimental import pallas as pl
from jax.experimental.pallas import tpu as pltpu


def _cgn_kernel(x_ref, w_ref, m_ref, p_ref, o_ref, *, starts, tap_js,
                needs_mask, hw, gsz, n_groups, inv_count, eps):
    # x_ref: (1, C_in, FL)   H-padded, W-flattened input (bf16)
    # w_ref: (C_out, KH*KW*C_in) fused conv weight (bf16)
    # m_ref: (KW, HW)        row-boundary validity masks (bf16, 0/1)
    # p_ref: (C_out, 3)      packed [bias | gamma | beta] (f32)
    # o_ref: (1, C_out, HW)  output in channel-major (== NCHW flattened)
    xf = x_ref[0]                               # (C_in, FL) bf16
    masks = m_ref[...]                          # (KW, HW)   bf16
    c_out = o_ref.shape[1]

    # --- Conv: build the stacked im2col RHS from shifted (masked) slices and
    # run ONE K = KH*KW*C_in matmul on the MXU with f32 accumulation.
    # TODO(synk): pre-mask / pre-stack wrapper-side on v5e to avoid the
    # emulated bf16 boundary-mask multiplies (tiny at this size).
    taps = []
    for st, j in zip(starts, tap_js):
        sl = xf[:, st:st + hw]                  # (C_in, HW) bf16 lane shift
        if needs_mask[j]:                       # zero out row-wrap columns
            sl = sl * masks[j:j + 1, :]
        taps.append(sl)
    rhs = jnp.concatenate(taps, axis=0)         # (KH*KW*C_in, HW) bf16
    y = jnp.dot(w_ref[...], rhs,
                preferred_element_type=jnp.float32)        # (C_out, HW) f32

    # --- GroupNorm statistics on the MXU.  Conv bias enters only the
    # channel-scalar math:  z = y + b  =>  sum(z) = sum(y) + HW*b,
    # sum(z^2) = sum(y^2) + 2*b*sum(y) + HW*b^2.
    bias = p_ref[:, 0:1]                        # (C_out, 1) f32
    gamma = p_ref[:, 1:2]
    beta = p_ref[:, 2:3]

    ones_hw = jnp.ones((hw, 1), jnp.float32)
    ly = jnp.concatenate([y, y * y], axis=0)                     # (2C, HW)
    sums = jnp.dot(ly, ones_hw, preferred_element_type=jnp.float32)  # (2C,1)
    sum_c = sums[:c_out]
    sum2_c = sums[c_out:]
    fhw = float(hw)
    sum_zc = sum_c + fhw * bias
    sum2_zc = sum2_c + 2.0 * bias * sum_c + fhw * bias * bias
    stat_c = jnp.concatenate([sum_zc, sum2_zc], axis=1)          # (C, 2)

    # One-hot group membership built in-kernel (no extra operand DMAs, no
    # in-kernel transpose).
    gi = lax.broadcasted_iota(jnp.int32, (n_groups, c_out), 0)
    ci = lax.broadcasted_iota(jnp.int32, (n_groups, c_out), 1)
    gsel = ((ci >= gi * gsz) & (ci < (gi + 1) * gsz)).astype(jnp.float32)
    ci2 = lax.broadcasted_iota(jnp.int32, (c_out, n_groups), 0)
    gi2 = lax.broadcasted_iota(jnp.int32, (c_out, n_groups), 1)
    gbrd = ((ci2 >= gi2 * gsz) & (ci2 < (gi2 + 1) * gsz)).astype(jnp.float32)

    stat_g = jnp.dot(gsel, stat_c, preferred_element_type=jnp.float32)  # (G,2)
    mean_g = stat_g[:, 0:1] * inv_count
    # Single-pass variance can go slightly negative in f32; clamp before rsqrt.
    var_g = jnp.maximum(stat_g[:, 1:2] * inv_count - mean_g * mean_g, 0.0)
    inv_g = lax.rsqrt(var_g + eps)
    mi_g = jnp.concatenate([mean_g, inv_g], axis=1)                     # (G,2)
    mi_c = jnp.dot(gbrd, mi_g, preferred_element_type=jnp.float32)      # (C,2)
    mean_c = mi_c[:, 0:1]
    inv_c = mi_c[:, 1:2]

    # Fused affine: out = (y + b - mean) * inv * gamma + beta = y*scale + shift.
    scale_c = inv_c * gamma
    shift_c = (bias - mean_c) * scale_c + beta
    o_ref[0] = (y * scale_c + shift_c).astype(o_ref.dtype)


def conv2d_groupnorm(x_nchw, weight_oihw, bias, gamma, beta, *,
                     stride=1, padding=1, dilation=1, n_groups=16, eps=1e-5):
    N, C_in, H, W = x_nchw.shape
    C_out, C_in_w, KH, KW = weight_oihw.shape
    assert C_in_w == C_in
    assert C_out % n_groups == 0, "n_filters must be divisible by n_groups"
    gsz = C_out // n_groups

    # The in-kernel shifted-slice conv covers stride=1 with 2*padding >=
    # dilation*(k-1) (the usual "same"-style configs used by this module).
    # TODO(synk): add a strided / narrow-padding path (strided lane slices or
    # wrapper-side gather) for stride>1 or 2*padding < dilation*(KW-1).
    assert stride == 1, "only stride=1 implemented"
    s_w = 2 * padding - dilation * (KW - 1)
    assert s_w >= 0, "needs 2*padding >= dilation*(k-1)"

    HO = H + 2 * padding - dilation * (KH - 1)
    WO = W + 2 * padding - dilation * (KW - 1)
    assert HO >= 1 and WO >= 1
    HW = HO * WO
    HP = H + 2 * padding
    Wq = W + s_w                      # == WO: flattened row width == output width

    # --- glue (cheap, ~1x input size): pad H fully, pad W on the right by s_w,
    # flatten spatial row-major, add front/tail zeros so every tap slice is a
    # pure in-bounds lane shift.  Stays channel-major (NCHW) throughout.
    xq = jnp.pad(x_nchw, ((0, 0), (0, 0), (padding, padding), (0, s_w)))
    xflat = xq.reshape(N, C_in, HP * Wq)
    front = padding
    starts = tuple(front + i * dilation * Wq + j * dilation - padding
                   for i in range(KH) for j in range(KW))
    tap_js = tuple(j for i in range(KH) for j in range(KW))
    core_len = HP * Wq
    FL = max(front + core_len, max(starts) + HW)
    FL = ((FL + 127) // 128) * 128
    xflat = jnp.pad(xflat, ((0, 0), (0, 0), (front, FL - front - core_len)))
    xflat = xflat.astype(jnp.bfloat16)

    # Fused conv weight: (C_out, KH*KW*C_in), column index = (i*KW+j)*C_in + c,
    # matching the in-kernel stacked-RHS row order (tap-major, channel-minor).
    w2d = jnp.transpose(weight_oihw, (0, 2, 3, 1)).reshape(
        C_out, KH * KW * C_in).astype(jnp.bfloat16)

    # Row-boundary masks: tap j at output column w reads flattened column
    # w + j*dilation - padding; zero it when that wraps outside [0, Wq).
    w_idx = np.arange(WO)
    mask_rows, needs_mask = [], []
    for j in range(KW):
        c = w_idx + j * dilation - padding
        row = ((c >= 0) & (c < Wq)).astype(np.float32)
        mask_rows.append(row)
        needs_mask.append(not bool(row.all()))
    masks = jnp.asarray(np.tile(np.stack(mask_rows), (1, HO)),
                        dtype=jnp.bfloat16)                    # (KW, HW)
    needs_mask = tuple(needs_mask)

    # Packed channel parameters: [bias | gamma | beta]  (C_out, 3) f32.
    params = jnp.stack([bias.astype(jnp.float32),
                        gamma.astype(jnp.float32),
                        beta.astype(jnp.float32)], axis=1)

    kernel = functools.partial(
        _cgn_kernel, starts=starts, tap_js=tap_js, needs_mask=needs_mask,
        hw=HW, gsz=gsz, n_groups=n_groups,
        inv_count=1.0 / float(gsz * HW), eps=float(eps))

    # Advisory cost estimate (conv dominates; GN dots/elementwise are small).
    conv_flops = 2 * N * C_out * HW * (KH * KW * C_in)
    gn_flops = N * (2 * (2 * C_out) * HW + 8 * n_groups * C_out
                    + 6 * C_out * HW)
    cost = pl.CostEstimate(
        flops=int(conv_flops + gn_flops),
        transcendentals=int(N * n_groups),
        bytes_accessed=int(xflat.size * 2 + w2d.size * 2 + masks.size * 2
                           + params.size * 4 + N * C_out * HW * 4))

    # TODO(synk): for large H*W (v7x 64 MiB VMEM), tile the HW axis with
    # streaming sum/sumsq accumulation, a pl.when finalize on the last tile,
    # and an explicit vmem_limit_bytes in CompilerParams.
    out = pl.pallas_call(
        kernel,
        out_shape=jax.ShapeDtypeStruct((N, C_out, HW), jnp.float32),
        grid=(N,),
        in_specs=[
            pl.BlockSpec((1, C_in, FL), lambda n: (n, 0, 0)),
            pl.BlockSpec((C_out, KH * KW * C_in), lambda n: (0, 0)),
            pl.BlockSpec((KW, HW), lambda n: (0, 0)),
            pl.BlockSpec((C_out, 3), lambda n: (0, 0)),
        ],
        out_specs=pl.BlockSpec((1, C_out, HW), lambda n: (n, 0, 0)),
        compiler_params=pltpu.CompilerParams(
            dimension_semantics=("parallel",)),
        cost_estimate=cost,
    )(xflat, w2d, masks, params)

    # Metadata-only reshape: output is already channel-major (NCHW).
    return out.reshape(N, C_out, HO, WO)


def _reference(x_nchw, weight_oihw, bias, gamma, beta, *,
               stride, padding, dilation, n_groups, eps=1e-5):
    # Pure-JAX f32 reference matching PyTorch Conv2d -> GroupNorm semantics.
    y = lax.conv_general_dilated(
        x_nchw, weight_oihw, window_strides=(stride, stride),
        padding=((padding, padding), (padding, padding)),
        rhs_dilation=(dilation, dilation),
        dimension_numbers=("NCHW", "OIHW", "NCHW"))
    y = y + bias.reshape(1, -1, 1, 1)
    N, C, HH, WW = y.shape
    gsz = C // n_groups
    yg = y.reshape(N, n_groups, gsz, HH, WW)
    mean = yg.mean(axis=(2, 3, 4), keepdims=True)
    var = yg.var(axis=(2, 3, 4), keepdims=True)
    yn = ((yg - mean) / jnp.sqrt(var + eps)).reshape(N, C, HH, WW)
    return yn * gamma.reshape(1, -1, 1, 1) + beta.reshape(1, -1, 1, 1)


if __name__ == "__main__":
    # conv2DGroupNorm(in_channels=4, n_filters=32, k_size=3, stride=1,
    #                 padding=1, bias=True, dilation=1, n_groups=16)
    N, C_in, H, W = 2, 4, 16, 16
    C_out, ksize, stride, padding, dilation, n_groups = 32, 3, 1, 1, 1, 16

    key = jax.random.PRNGKey(0)
    k1, k2, k3, k4, k5 = jax.random.split(key, 5)
    x = jax.random.normal(k1, (N, C_in, H, W), jnp.float32)
    weight = 0.1 * jax.random.normal(k2, (C_out, C_in, ksize, ksize), jnp.float32)  # OIHW
    bias = 0.1 * jax.random.normal(k3, (C_out,), jnp.float32)
    gamma = 1.0 + 0.1 * jax.random.normal(k4, (C_out,), jnp.float32)
    beta = 0.1 * jax.random.normal(k5, (C_out,), jnp.float32)

    out = conv2d_groupnorm(x, weight, bias, gamma, beta,
                           stride=stride, padding=padding,
                           dilation=dilation, n_groups=n_groups)
    out = jax.block_until_ready(out)
    assert out.shape == (N, C_out, H, W), out.shape

    ref = _reference(x, weight, bias, gamma, beta,
                     stride=stride, padding=padding,
                     dilation=dilation, n_groups=n_groups)
    # NOTE: bf16 conv-matmul operands -> results deviate from PyTorch's f32
    # Conv2d by up to this loosened tolerance.
    err = float(jnp.max(jnp.abs(out - ref)))
    if err > 5e-2:
        raise AssertionError(f"Pallas kernel mismatch vs reference: max abs err {err}")

    print("KERNEL_OK")
</pallas_src>

<mosaic_0001>
module attributes {stable_mosaic.version = 11 : i64} {
  func.func @_cgn_kernel(%arg0: i32, %arg1: memref<1x4x384xbf16, #tpu.memory_space<vmem>>, %arg2: memref<32x36xbf16, #tpu.memory_space<vmem>>, %arg3: memref<3x256xbf16, #tpu.memory_space<vmem>>, %arg4: memref<32x3xf32, #tpu.memory_space<vmem>>, %arg5: memref<1x32x256xf32, #tpu.memory_space<vmem>>) attributes {dimension_semantics = [#tpu.dimension_semantics<parallel>], iteration_bounds = array<i64: 2>, scalar_prefetch = 0 : i64, scratch_operands = 0 : i64, tpu.core_type = #tpu.core_type<tc>, window_params = [{transform_indices = @transform_0, window_bounds = array<i64: 1, 4, 384>}, {pipeline_mode = #tpu.pipeline_mode<synchronous>, transform_indices = @transform_1, window_bounds = array<i64: 32, 36>}, {pipeline_mode = #tpu.pipeline_mode<synchronous>, transform_indices = @transform_2, window_bounds = array<i64: 3, 256>}, {pipeline_mode = #tpu.pipeline_mode<synchronous>, transform_indices = @transform_3, window_bounds = array<i64: 32, 3>}, {transform_indices = @transform_4, window_bounds = array<i64: 1, 32, 256>}]} {
    %c0 = arith.constant 0 : index
    %c0_0 = arith.constant 0 : index
    %c0_1 = arith.constant 0 : index
    %0 = vector.load %arg1[%c0, %c0_0, %c0_1] : memref<1x4x384xbf16, #tpu.memory_space<vmem>>, vector<1x4x384xbf16>
    %1 = vector.shape_cast %0 : vector<1x4x384xbf16> to vector<4x384xbf16>
    %c0_2 = arith.constant 0 : index
    %c0_3 = arith.constant 0 : index
    %2 = vector.load %arg3[%c0_2, %c0_3] : memref<3x256xbf16, #tpu.memory_space<vmem>>, vector<3x256xbf16>
    %3 = vector.extract_strided_slice %1 {offsets = [0, 0], sizes = [4, 256], strides = [1, 1]} : vector<4x384xbf16> to vector<4x256xbf16>
    %4 = vector.extract_strided_slice %2 {offsets = [0, 0], sizes = [1, 256], strides = [1, 1]} : vector<3x256xbf16> to vector<1x256xbf16>
    %5 = vector.broadcast %4 : vector<1x256xbf16> to vector<4x256xbf16>
    %6 = arith.mulf %3, %5 : vector<4x256xbf16>
    %7 = vector.extract_strided_slice %1 {offsets = [0, 1], sizes = [4, 256], strides = [1, 1]} : vector<4x384xbf16> to vector<4x256xbf16>
    %8 = vector.extract_strided_slice %1 {offsets = [0, 2], sizes = [4, 256], strides = [1, 1]} : vector<4x384xbf16> to vector<4x256xbf16>
    %9 = vector.extract_strided_slice %2 {offsets = [2, 0], sizes = [1, 256], strides = [1, 1]} : vector<3x256xbf16> to vector<1x256xbf16>
    %10 = vector.broadcast %9 : vector<1x256xbf16> to vector<4x256xbf16>
    %11 = arith.mulf %8, %10 : vector<4x256xbf16>
    %12 = vector.extract_strided_slice %1 {offsets = [0, 16], sizes = [4, 256], strides = [1, 1]} : vector<4x384xbf16> to vector<4x256xbf16>
    %13 = vector.extract_strided_slice %2 {offsets = [0, 0], sizes = [1, 256], strides = [1, 1]} : vector<3x256xbf16> to vector<1x256xbf16>
    %14 = vector.broadcast %13 : vector<1x256xbf16> to vector<4x256xbf16>
    %15 = arith.mulf %12, %14 : vector<4x256xbf16>
    %16 = vector.extract_strided_slice %1 {offsets = [0, 17], sizes = [4, 256], strides = [1, 1]} : vector<4x384xbf16> to vector<4x256xbf16>
    %17 = vector.extract_strided_slice %1 {offsets = [0, 18], sizes = [4, 256], strides = [1, 1]} : vector<4x384xbf16> to vector<4x256xbf16>
    %18 = vector.extract_strided_slice %2 {offsets = [2, 0], sizes = [1, 256], strides = [1, 1]} : vector<3x256xbf16> to vector<1x256xbf16>
    %19 = vector.broadcast %18 : vector<1x256xbf16> to vector<4x256xbf16>
    %20 = arith.mulf %17, %19 : vector<4x256xbf16>
    %21 = vector.extract_strided_slice %1 {offsets = [0, 32], sizes = [4, 256], strides = [1, 1]} : vector<4x384xbf16> to vector<4x256xbf16>
    %22 = vector.extract_strided_slice %2 {offsets = [0, 0], sizes = [1, 256], strides = [1, 1]} : vector<3x256xbf16> to vector<1x256xbf16>
    %23 = vector.broadcast %22 : vector<1x256xbf16> to vector<4x256xbf16>
    %24 = arith.mulf %21, %23 : vector<4x256xbf16>
    %25 = vector.extract_strided_slice %1 {offsets = [0, 33], sizes = [4, 256], strides = [1, 1]} : vector<4x384xbf16> to vector<4x256xbf16>
    %26 = vector.extract_strided_slice %1 {offsets = [0, 34], sizes = [4, 256], strides = [1, 1]} : vector<4x384xbf16> to vector<4x256xbf16>
    %27 = vector.extract_strided_slice %2 {offsets = [2, 0], sizes = [1, 256], strides = [1, 1]} : vector<3x256xbf16> to vector<1x256xbf16>
    %28 = vector.broadcast %27 : vector<1x256xbf16> to vector<4x256xbf16>
    %29 = arith.mulf %26, %28 : vector<4x256xbf16>
    %30 = tpu.concatenate %6, %7, %11, %15, %16, %20, %24, %25, %29 in 0 : vector<4x256xbf16>, vector<4x256xbf16>, vector<4x256xbf16>, vector<4x256xbf16>, vector<4x256xbf16>, vector<4x256xbf16>, vector<4x256xbf16>, vector<4x256xbf16>, vector<4x256xbf16> -> vector<36x256xbf16>
    %c0_4 = arith.constant 0 : index
    %c0_5 = arith.constant 0 : index
    %31 = vector.load %arg2[%c0_4, %c0_5] : memref<32x36xbf16, #tpu.memory_space<vmem>>, vector<32x36xbf16>
    %cst = arith.constant dense<0.000000e+00> : vector<32x256xf32>
    %32 = tpu.matmul %31, %30, %cst {dimension_numbers = #tpu.dot_dimension_numbers<[1], [0], [0], [1], [0, 0, 1, 1], [], []>} : vector<32x36xbf16>, vector<36x256xbf16>, vector<32x256xf32> -> vector<32x256xf32>
    %c0_6 = arith.constant 0 : index
    %c0_7 = arith.constant 0 : index
    %33 = vector.load %arg4[%c0_6, %c0_7] : memref<32x3xf32, #tpu.memory_space<vmem>>, vector<32x1xf32>
    %c0_8 = arith.constant 0 : index
    %c1 = arith.constant 1 : index
    %34 = vector.load %arg4[%c0_8, %c1] : memref<32x3xf32, #tpu.memory_space<vmem>>, vector<32x1xf32>
    %c0_9 = arith.constant 0 : index
    %c2 = arith.constant 2 : index
    %35 = vector.load %arg4[%c0_9, %c2] : memref<32x3xf32, #tpu.memory_space<vmem>>, vector<32x1xf32>
    %cst_10 = arith.constant 1.000000e+00 : f32
    %36 = vector.broadcast %cst_10 : f32 to vector<256x1xf32>
    %37 = arith.mulf %32, %32 : vector<32x256xf32>
    %38 = tpu.concatenate %32, %37 in 0 : vector<32x256xf32>, vector<32x256xf32> -> vector<64x256xf32>
    %cst_11 = arith.constant dense<0.000000e+00> : vector<64x1xf32>
    %39 = tpu.matmul %38, %36, %cst_11 {dimension_numbers = #tpu.dot_dimension_numbers<[1], [0], [0], [1], [0, 0, 1, 1], [], []>} : vector<64x256xf32>, vector<256x1xf32>, vector<64x1xf32> -> vector<64x1xf32>
    %40 = vector.extract_strided_slice %39 {offsets = [0, 0], sizes = [32, 1], strides = [1, 1]} : vector<64x1xf32> to vector<32x1xf32>
    %41 = vector.extract_strided_slice %39 {offsets = [32, 0], sizes = [32, 1], strides = [1, 1]} : vector<64x1xf32> to vector<32x1xf32>
    %cst_12 = arith.constant 2.560000e+02 : f32
    %42 = vector.broadcast %cst_12 : f32 to vector<32x1xf32>
    %43 = arith.mulf %42, %33 : vector<32x1xf32>
    %44 = arith.addf %40, %43 : vector<32x1xf32>
    %cst_13 = arith.constant 2.000000e+00 : f32
    %45 = vector.broadcast %cst_13 : f32 to vector<32x1xf32>
    %46 = arith.mulf %45, %33 : vector<32x1xf32>
    %47 = arith.mulf %46, %40 : vector<32x1xf32>
    %48 = arith.addf %41, %47 : vector<32x1xf32>
    %cst_14 = arith.constant 2.560000e+02 : f32
    %49 = vector.broadcast %cst_14 : f32 to vector<32x1xf32>
    %50 = arith.mulf %49, %33 : vector<32x1xf32>
    %51 = arith.mulf %50, %33 : vector<32x1xf32>
    %52 = arith.addf %48, %51 : vector<32x1xf32>
    %53 = tpu.concatenate %44, %52 in 1 : vector<32x1xf32>, vector<32x1xf32> -> vector<32x2xf32>
    %54 = tpu.iota {dimensions = array<i32: 0>} : vector<16x32xi32>
    %55 = tpu.iota {dimensions = array<i32: 1>} : vector<16x32xi32>
    %c2_i32 = arith.constant 2 : i32
    %56 = vector.broadcast %c2_i32 : i32 to vector<16x32xi32>
    %57 = arith.muli %54, %56 : vector<16x32xi32>
    %58 = arith.cmpi sge, %55, %57 : vector<16x32xi32>
    %c1_i32 = arith.constant 1 : i32
    %59 = vector.broadcast %c1_i32 : i32 to vector<16x32xi32>
    %60 = arith.addi %54, %59 : vector<16x32xi32>
    %c2_i32_15 = arith.constant 2 : i32
    %61 = vector.broadcast %c2_i32_15 : i32 to vector<16x32xi32>
    %62 = arith.muli %60, %61 : vector<16x32xi32>
    %63 = arith.cmpi slt, %55, %62 : vector<16x32xi32>
    %64 = arith.andi %58, %63 : vector<16x32xi1>
    %65 = arith.extui %64 : vector<16x32xi1> to vector<16x32xi32>
    %66 = arith.sitofp %65 : vector<16x32xi32> to vector<16x32xf32>
    %67 = tpu.iota {dimensions = array<i32: 0>} : vector<32x16xi32>
    %68 = tpu.iota {dimensions = array<i32: 1>} : vector<32x16xi32>
    %c2_i32_16 = arith.constant 2 : i32
    %69 = vector.broadcast %c2_i32_16 : i32 to vector<32x16xi32>
    %70 = arith.muli %68, %69 : vector<32x16xi32>
    %71 = arith.cmpi sge, %67, %70 : vector<32x16xi32>
    %c1_i32_17 = arith.constant 1 : i32
    %72 = vector.broadcast %c1_i32_17 : i32 to vector<32x16xi32>
    %73 = arith.addi %68, %72 : vector<32x16xi32>
    %c2_i32_18 = arith.constant 2 : i32
    %74 = vector.broadcast %c2_i32_18 : i32 to vector<32x16xi32>
    %75 = arith.muli %73, %74 : vector<32x16xi32>
    %76 = arith.cmpi slt, %67, %75 : vector<32x16xi32>
    %77 = arith.andi %71, %76 : vector<32x16xi1>
    %78 = arith.extui %77 : vector<32x16xi1> to vector<32x16xi32>
    %79 = arith.sitofp %78 : vector<32x16xi32> to vector<32x16xf32>
    %cst_19 = arith.constant dense<0.000000e+00> : vector<16x2xf32>
    %80 = tpu.matmul %66, %53, %cst_19 {dimension_numbers = #tpu.dot_dimension_numbers<[1], [0], [0], [1], [0, 0, 1, 1], [], []>} : vector<16x32xf32>, vector<32x2xf32>, vector<16x2xf32> -> vector<16x2xf32>
    %81 = vector.extract_strided_slice %80 {offsets = [0, 0], sizes = [16, 1], strides = [1, 1]} : vector<16x2xf32> to vector<16x1xf32>
    %cst_20 = arith.constant 0.001953125 : f32
    %82 = vector.broadcast %cst_20 : f32 to vector<16x1xf32>
    %83 = arith.mulf %81, %82 : vector<16x1xf32>
    %84 = vector.extract_strided_slice %80 {offsets = [0, 1], sizes = [16, 1], strides = [1, 1]} : vector<16x2xf32> to vector<16x1xf32>
    %cst_21 = arith.constant 0.001953125 : f32
    %85 = vector.broadcast %cst_21 : f32 to vector<16x1xf32>
    %86 = arith.mulf %84, %85 : vector<16x1xf32>
    %87 = arith.mulf %83, %83 : vector<16x1xf32>
    %88 = arith.subf %86, %87 : vector<16x1xf32>
    %cst_22 = arith.constant 0.000000e+00 : f32
    %89 = vector.broadcast %cst_22 : f32 to vector<16x1xf32>
    %90 = arith.maximumf %88, %89 : vector<16x1xf32>
    %cst_23 = arith.constant 9.99999974E-6 : f32
    %91 = vector.broadcast %cst_23 : f32 to vector<16x1xf32>
    %92 = arith.addf %90, %91 : vector<16x1xf32>
    %93 = math.rsqrt %92 : vector<16x1xf32>
    %94 = tpu.concatenate %83, %93 in 1 : vector<16x1xf32>, vector<16x1xf32> -> vector<16x2xf32>
    %cst_24 = arith.constant dense<0.000000e+00> : vector<32x2xf32>
    %95 = tpu.matmul %79, %94, %cst_24 {dimension_numbers = #tpu.dot_dimension_numbers<[1], [0], [0], [1], [0, 0, 1, 1], [], []>} : vector<32x16xf32>, vector<16x2xf32>, vector<32x2xf32> -> vector<32x2xf32>
    %96 = vector.extract_strided_slice %95 {offsets = [0, 0], sizes = [32, 1], strides = [1, 1]} : vector<32x2xf32> to vector<32x1xf32>
    %97 = vector.extract_strided_slice %95 {offsets = [0, 1], sizes = [32, 1], strides = [1, 1]} : vector<32x2xf32> to vector<32x1xf32>
    %98 = arith.mulf %97, %34 : vector<32x1xf32>
    %99 = arith.subf %33, %96 : vector<32x1xf32>
    %100 = arith.mulf %99, %98 : vector<32x1xf32>
    %101 = arith.addf %100, %35 : vector<32x1xf32>
    %102 = vector.broadcast %98 : vector<32x1xf32> to vector<32x256xf32>
    %103 = arith.mulf %32, %102 : vector<32x256xf32>
    %104 = vector.broadcast %101 : vector<32x1xf32> to vector<32x256xf32>
    %105 = arith.addf %103, %104 : vector<32x256xf32>
    %c0_25 = arith.constant 0 : index
    %c0_26 = arith.constant 0 : index
    %c0_27 = arith.constant 0 : index
    %106 = vector.load %arg5[%c0_25, %c0_26, %c0_27] : memref<1x32x256xf32, #tpu.memory_space<vmem>>, vector<1x32x256xf32>
    %107 = vector.shape_cast %106 : vector<1x32x256xf32> to vector<32x256xf32>
    %108 = vector.shape_cast %105 : vector<32x256xf32> to vector<1x32x256xf32>
    tpu.vector_store %arg5[%c0_25, %c0_26, %c0_27], %108 {strides = array<i32>} : memref<1x32x256xf32, #tpu.memory_space<vmem>>, vector<1x32x256xf32>,
    return
  }
  func.func @transform_0(%arg0: i32) -> (i32, i32, i32) {
    %c0_i32 = arith.constant 0 : i32
    %c0_i32_0 = arith.constant 0 : i32
    %c0_i32_1 = arith.constant 0 : i32
    return %arg0, %c0_i32, %c0_i32_0 : i32, i32, i32
  }
  func.func @transform_1(%arg0: i32) -> (i32, i32) {
    %c0_i32 = arith.constant 0 : i32
    %c0_i32_0 = arith.constant 0 : i32
    %c0_i32_1 = arith.constant 0 : i32
    return %c0_i32, %c0_i32_0 : i32, i32
  }
  func.func @transform_2(%arg0: i32) -> (i32, i32) {
    %c0_i32 = arith.constant 0 : i32
    %c0_i32_0 = arith.constant 0 : i32
    %c0_i32_1 = arith.constant 0 : i32
    return %c0_i32, %c0_i32_0 : i32, i32
  }
  func.func @transform_3(%arg0: i32) -> (i32, i32) {
    %c0_i32 = arith.constant 0 : i32
    %c0_i32_0 = arith.constant 0 : i32
    %c0_i32_1 = arith.constant 0 : i32
    return %c0_i32, %c0_i32_0 : i32, i32
  }
  func.func @transform_4(%arg0: i32) -> (i32, i32, i32) {
    %c0_i32 = arith.constant 0 : i32
    %c0_i32_0 = arith.constant 0 : i32
    %c0_i32_1 = arith.constant 0 : i32
    return %arg0, %c0_i32, %c0_i32_0 : i32, i32, i32
  }
}

</mosaic_0001>

<bundles_post_ra>
// kernel: tpu_custom_call.1
= control target key start
LH: loop header
LB: loop body
LE: loop exit
PB: predicated region body
PF: predicated region fallthrough
CT: control target
= control target key end

     0   :  { %9 = vsyncpa [#allocation3], 0  ;;  %s1684_s0 = inlined_call_operand.vmem [shape: bf16[2,4,384], index: 0, kind: input, shape index: {}]   ;;  %s1685_s1 = inlined_call_operand.vmem [shape: bf16[32,36], index: 1, kind: input, shape index: {}]   ;;  %s1686_s2 = inlined_call_operand.vmem [shape: bf16[3,256], index: 2, kind: input, shape index: {}]   ;;  %s1687_s3 = inlined_call_operand.vmem [shape: f32[32,3], index: 3, kind: input, shape index: {}]   ;;  %s1688_s4 = inlined_call_operand.hbm [shape: f32[2,32,256], index: 4, kind: output, shape index: {}]  }
   0x1   :  { %11 = vsyncpa [#allocation3 + $0x1], 0  ;;  %s1324_s15 = smov 0   ;;  %s1326_s16 = smov 0  }
   0x2   :  { %s1328_s17 = smov 0   ;;  %s1330_s18 = smov 0  }
   0x3 LB: > { %s1345_s19 = sadd.s32 4294967295, %s1278_s18   ;;  %s1083_s20 = sadd.s32 4294967294, %s1278_s18   ;;  %s1278_s18 = sphi %s1330_s18, %s1694_s18   ;;  %s1274_s17 = sphi %s1328_s17, %s1693_s17   ;;  %s1270_s16 = sphi %s1326_s16, %s1692_s16   ;;  %s1266_s15 = sphi %s1324_s15, %s1691_s15  }
   0x4   : > { %s1349_s21 = sadd.s32 1, %s1278_s18   ;;  %s113_s22 = sadd.s32 1, %s1274_s17 }
   0x5   : > { %s110_s23 = ssub.s32 %s1278_s18, %s1349_s21  ;;  %p123_p0 = scmp.ne.s32.totalorder %s1274_s17, %s1270_s16 }
   0x6   : > { %p111_p1 = scmp.eq.s32.totalorder %s110_s23, 0  ;;  %p124_p2 = scmp.eq.s32.totalorder %s1345_s19, 1 }
   0x7   : > { %p129_p3 = scmp.ne.s32.totalorder %s1270_s16, %s1266_s15  ;;  %p130_p4 = scmp.eq.s32.totalorder %s1083_s20, 1 }
   0x8   : > { %s1360_s24 = scalar_select %p111_p1, %s1274_s17, %s113_s22  }
   0x9   : > { %p1362_p5 = por %p124_p2, %p123_p0  ;;  %p1366_p6 = por %p130_p4, %p129_p3 }
   0xa   : > { %p1086_p7 = scmp.ge.s32.totalorder %s1278_s18, 1  ;;  %p165_p8 = scmp.lt.s32.totalorder %s1278_s18, 3 }
   0xc   : > { %p166_p9 = pnand %p1086_p7, %p165_p8 }
   0xd   : > { %p191_p10 = scmp.lt.s32.totalorder (!%p166_p9), %s1345_s19, 1  ;;  %s1280_s8 = smov (!%p166_p9), 2  }
   0xe   : > { %169 = sbr.rel (%p166_p9) target bundleno = 1493 (0x5d5), region = 36  ;;  %s1281_s9 = smov (!%p166_p9), 18  }
   0xf   : > { %s1282_s10 = smov (!%p166_p9), 34   ;;  %s1283_s11 = smov (!%p166_p9), 16  }
  0x10   : > { %s1284_s12 = smov (!%p166_p9), 32   ;;  %s1285_s13 = smov (!%p166_p9), 126  }
  0x11   : > { %s1286_s14 = smov (!%p166_p9), 110   ;;  %s1287_s20 = smov (!%p166_p9), 96  }
  0x12   : > { %s1288_s22 = smov (!%p166_p9), 94   ;;  %s1289_s23 = smov (!%p166_p9), 127  }
  0x13   : > { %v198_v0 = vld [vmem:[%s1686_s2] sm:$0xf]  ;;  %s192_s29 = scalar_select %p191_p10, %s1345_s19, 1  ;;  %vm215_vm0 = vcmask 1043456   ;;  %vm245_vm1 = vcmask 15360   ;;  %vm267_vm2 = vcmask 130048  }
  0x14   : > { %200 = vst [vmem:[#allocation1] ss:$4 sm:$0xff] %v198_v0  ;;  %vm289_vm3 = vcmask 146432   ;;  %vm311_vm4 = vcmask 261120   ;;  %vm333_vm5 = vcmask 277504   ;;  %s1290_s27 = smov 111  }
  0x15   : > { %s1137_s30 = smul.u32 6, %s192_s29  ;;  %s1291_s28 = smov 95   ;;  %vm496_vm6 = vcmask 769024   ;;  %vm499_vm7 = vcmask 1041408   ;;  %vm425_vm8 = vcmask 908288   ;;  %vm445_vm9 = vcmask 900096  }
  0x16   : > { %s1292_s29 = smov 112   ;;  %vm462_vm10 = vcmask 785408   ;;  %vm479_vm11 = vcmask 777216   ;;  %vm510_vm12 = vcmask 1045504   ;;  %vm372_vm13 = vcmask 1039360  }
  0x17   : > { %s195_s7 = scalar_lea.vmem %s1684_s0, %s1137_s30  ;;  %vm389_vm14 = vcmask 1031168   ;;  %vm409_vm15 = vcmask 916480   ;;  %s1120_s30 = sshll.u32 %s1345_s19, 6 }
  0x18   : > { %v1380_v5 = vld [vmem:[%s195_s7] sm:$0x3f]  ;;  %s1017_s7 = scalar_lea.hbm %s1688_s4, %s1120_s30 }
  0x19   : > { %v1383_v10 = vunpack.c.l.bf16 %v1380_v5  ;;  %v235_v26 = vunpack.c.h.bf16 %v1380_v5 }
  0x1b   : > { %v201_v1 = vld.sshfl [vmem:[#allocation1] sm:$0xff pattern:$0x73625140]  ;;  %v202_v2 = vld.sshfl [vmem:[#allocation1 + $0x8] sm:$0xff pattern:$0x73625140] }
  0x1c   : > { %v203_v3 = vpack.i.b16 %v201_v1, %v201_v1  ;;  %v206_v4 = vpack.i.b16 %v202_v2, %v202_v2 }
  0x1e   : > { %v205_v6 = vperm.slane %v203_v3, 0  ;;  %v208_v7 = vperm.slane %v206_v4, 0 }
  0x20   : > { %v210_v8 = vunpack.c.l.bf16 %v205_v6  ;;  %v211_v9 = vunpack.c.l.bf16 %v208_v7 }
  0x22   : > { %v214_v11 = vrot.slane %v211_v9, 4 }
  0x24   : > { %v216_v12 = vsel %vm215_vm0, %v210_v8, %v214_v11 }
  0x25   : > { %v218_v13 = vmul.f32 %v216_v12, %v1383_v10 }
  0x27   : > { %220 = vst [vmem:[#allocation1] ss:$2 sm:$0xff] %v218_v13 }
  0x2e   : > { %v1387_v14 = vld.sshfl [vmem:[#allocation1] sm:$0xff pattern:$0x75316420]  ;;  %v1389_v15 = vld.sshfl [vmem:[#allocation1 + $0x8] sm:$0xff pattern:$0x75316420] }
  0x2f   : > { %226 = vst [vmem:[#allocation1] ss:$4 sm:$0xff] %v198_v0 }
  0x36   : > { %v227_v16 = vld.sshfl [vmem:[#allocation1] sm:$0xff pattern:$0x73625140]  ;;  %v228_v17 = vld.sshfl [vmem:[#allocation1 + $0x8] sm:$0xff pattern:$0x73625140] }
  0x37   : > { %v229_v18 = vpack.i.b16 %v227_v16, %v227_v16  ;;  %v232_v19 = vpack.i.b16 %v228_v17, %v228_v17 }
  0x39   : > { %v231_v20 = vperm.slane %v229_v18, 1  ;;  %v234_v21 = vperm.slane %v232_v19, 1 }
  0x3b   : > { %v236_v22 = vunpack.c.l.bf16 %v231_v20  ;;  %v237_v23 = vunpack.c.l.bf16 %v234_v21 }
  0x3d   : > { %v240_v24 = vrot.slane %v237_v23, 4 }
  0x3f   : > { %v241_v25 = vsel %vm215_vm0, %v236_v22, %v240_v24 }
  0x40   : > { %242 = vrot.lane.b32.xlu0 %v241_v25, %s1280_s8  ;;  %286 = vrot.lane.b32.xlu1 %v241_v25, %s1281_s9  ;;  %s1020_s9 = sshll.u32 %s1017_s7, 4  ;;  %s1021_s9 = int_to_ptr.hbm [resolvable:$true] %s1020_s9 }
  0x41   : > { %330 = vrot.lane.b32.xlu2 %v241_v25, %s1282_s10  ;;  %s1230_s10 = sshra.s32 %s1021_s9, 4  ;;  %s1231_s10 = int_to_ptr.hbm [resolvable:$true] %s1230_s10 }
  0x42   : > { %p1237_p0 = scmp.lt.s32.totalorder %s1231_s10, %s1688_s4 }
  0x48   : > { %264 = vrot.lane.b32.xlu0 %v216_v12, %s1283_s11  ;;  %308 = vrot.lane.b32.xlu1 %v216_v12, %s1284_s12  ;;  %s1232_s12 = scalar_lea.hbm %s1231_s10, 64 }
  0x49   : > { %p1233_p11 = scmp.ne.s32.totalorder %s1231_s10, %s1232_s12 }
  0x4b   : > { %p1234_p12 = pnand %p1233_p11, %p1362_p5 }
  0x4d   : > { %p1235_p13 = pneg %p1234_p12 }
  0x9b   : > { %v331_v60 = vpop.permute.xlu2 %330 }
  0x9c   : > { %v332_v62 = vrot.slane %v331_v60, 4 }
  0x9e   : > { %v334_v6 = vsel %vm333_vm5, %v332_v62, %v331_v60  ;;  %v338_v7 = vmul.f32 %v332_v62, %v235_v26 }
  0x9f   : > { %v337_v12 = vmul.f32 %v334_v6, %v1383_v10 }
  0xb2   : > { %v243_v27 = vpop.permute.xlu0 %242  ;;  %v287_v34 = vpop.permute.xlu1 %286 }
  0xb3   : > { %v244_v28 = vrot.slane %v243_v27, 4  ;;  %v288_v41 = vrot.slane %v287_v34, 4 }
  0xb5   : > { %v246_v29 = vsel %vm245_vm1, %v244_v28, %v243_v27  ;;  %v250_v30 = vmul.f32 %v244_v28, %v235_v26  ;;  %v294_v45 = vmul.f32 %v288_v41, %v235_v26  ;;  %v290_v50 = vsel %vm289_vm3, %v288_v41, %v287_v34 }
  0xb6   : > { %v249_v31 = vmul.f32 %v246_v29, %v1383_v10  ;;  %v293_v55 = vmul.f32 %v290_v50, %v1383_v10  ;;  %vm547_vm1 = vcmask 293888  }
  0xb7   : > { %255 = vst [vmem:[#allocation1 + $0x10] ss:$2 sm:$0xff] %v250_v30 }
  0xb8   : > { %253 = vst [vmem:[#allocation1] ss:$2 sm:$0xff] %v249_v31 }
  0xba   : > { %v265_v32 = vpop.permute.xlu0 %264  ;;  %v309_v49 = vpop.permute.xlu1 %308 }
  0xbb   : > { %v266_v33 = vrot.slane %v265_v32, 4  ;;  %v310_v54 = vrot.slane %v309_v49, 4 }
  0xbd   : > { %v268_v35 = vsel %vm267_vm2, %v266_v33, %v265_v32  ;;  %v272_v36 = vmul.f32 %v266_v33, %v235_v26  ;;  %v312_v58 = vsel %vm311_vm4, %v310_v54, %v309_v49  ;;  %v316_v59 = vmul.f32 %v310_v54, %v235_v26 }
  0xbe   : > { %v258_v37 = vld.sshfl [vmem:[#allocation1 + $0x10] sm:$0xff pattern:$0x75316420]  ;;  %v271_v38 = vmul.f32 %v268_v35, %v1383_v10  ;;  %v315_v61 = vmul.f32 %v312_v58, %v1383_v10 }
  0xbf   : > { %277 = vst [vmem:[#allocation1 + $0x10] ss:$2 sm:$0xff] %v272_v36  ;;  %v263_v39 = vpack.c.bf16 %v258_v37, %v258_v37  ;;  %v256_v40 = vld.sshfl [vmem:[#allocation1] sm:$0xff pattern:$0x75316420] }
  0xc0   : > { %v257_v42 = vld.sshfl [vmem:[#allocation1 + $0x8] sm:$0xff pattern:$0x75316420] }
  0xc1   : > { %v379_v43 = vunpack.c.l.b16 %v263_v39  ;;  %v262_v44 = vpack.c.bf16 %v257_v42, %v256_v40  ;;  %275 = vst [vmem:[#allocation1] ss:$2 sm:$0xff] %v271_v38 }
  0xc3   : > { %v382_v46 = vpack.c.b16 %v379_v43, %v379_v43  ;;  %v378_v47 = vunpack.c.h.b16 %v262_v44  ;;  %v377_v48 = vunpack.c.l.b16 %v262_v44 }
  0xc5   : > { %387 = vrot.lane.b32.xlu1 %v382_v46, %s1285_s13  ;;  %v381_v51 = vpack.c.b16 %v378_v47, %v378_v47  ;;  %v380_v52 = vpack.c.b16 %v377_v48, %v377_v48 }
  0xc6   : > { %v1398_v53 = vld.sshfl [vmem:[#allocation1 + $0x10] sm:$0xff pattern:$0x75316420] }
  0xc7   : > { %299 = vst [vmem:[#allocation1 + $0x10] ss:$2 sm:$0xff] %v294_v45  ;;  %385 = vrot.lane.b32.xlu0 %v381_v51, %s1285_s13  ;;  %383 = vrot.lane.b32.xlu2 %v380_v52, %s1285_s13  ;;  %v285_v47 = vpack.c.bf16 %v1398_v53, %v1398_v53 }
  0xc8   : > { %v1403_v56 = vld.sshfl [vmem:[#allocation1] sm:$0xff pattern:$0x75316420]  ;;  %v1405_v57 = vld.sshfl [vmem:[#allocation1 + $0x8] sm:$0xff pattern:$0x75316420] }
  0xc9   : > { %297 = vst [vmem:[#allocation1] ss:$2 sm:$0xff] %v293_v55  ;;  %v284_v48 = vpack.c.bf16 %v1405_v57, %v1403_v56  ;;  %v396_v49 = vunpack.c.l.b16 %v285_v47 }
  0xcb   : > { %v395_v51 = vunpack.c.h.b16 %v284_v48  ;;  %v394_v52 = vunpack.c.l.b16 %v284_v48 }
  0xcd   : > { %v398_v58 = vpack.c.b16 %v395_v51, %v395_v51 }
  0xce   : > { %v302_v63 = vld.sshfl [vmem:[#allocation1 + $0x10] sm:$0xff pattern:$0x75316420] }
  0xcf   : > { %v307_v0 = vpack.c.bf16 %v302_v63, %v302_v63  ;;  %321 = vst [vmem:[#allocation1 + $0x10] ss:$2 sm:$0xff] %v316_v59  ;;  %v397_v59 = vpack.c.b16 %v394_v52, %v394_v52  ;;  %v401_v53 = vrot.slane %v398_v58, 2 }
  0xd0   : > { %v300_v1 = vld.sshfl [vmem:[#allocation1] sm:$0xff pattern:$0x75316420]  ;;  %v301_v2 = vld.sshfl [vmem:[#allocation1 + $0x8] sm:$0xff pattern:$0x75316420] }
  0xd1   : > { %v432_v3 = vunpack.c.l.b16 %v307_v0  ;;  %v306_v4 = vpack.c.bf16 %v301_v2, %v300_v1  ;;  %319 = vst [vmem:[#allocation1] ss:$2 sm:$0xff] %v315_v61  ;;  %v400_v61 = vrot.slane %v397_v59, 2  ;;  %v1118_v59 = vld [vmem:[%s1685_s1] sm:$0xff] }
  0xd3   : > { %v435_v8 = vpack.c.b16 %v432_v3, %v432_v3  ;;  %v431_v9 = vunpack.c.h.b16 %v306_v4  ;;  %v430_v11 = vunpack.c.l.b16 %v306_v4 }
  0xd5   : > { %v438_v13 = vrot.slane %v435_v8, 6  ;;  %v434_v16 = vpack.c.b16 %v431_v9, %v431_v9  ;;  %v433_v17 = vpack.c.b16 %v430_v11, %v430_v11 }
  0xd6   : > { %v324_v18 = vld.sshfl [vmem:[#allocation1 + $0x10] sm:$0xff pattern:$0x75316420] }
  0xd7   : > { %443 = vrot.lane.b32.xlu1 %v438_v13, %s1286_s14  ;;  %v437_v19 = vrot.slane %v434_v16, 6  ;;  %v436_v20 = vrot.slane %v433_v17, 6  ;;  %v329_v21 = vpack.c.bf16 %v324_v18, %v324_v18  ;;  %343 = vst [vmem:[#allocation1 + $0x10] ss:$2 sm:$0xff] %v338_v7 }
  0xd8   : > { %v322_v22 = vld.sshfl [vmem:[#allocation1] sm:$0xff pattern:$0x75316420]  ;;  %v323_v23 = vld.sshfl [vmem:[#allocation1 + $0x8] sm:$0xff pattern:$0x75316420] }
  0xd9   : > { %441 = vrot.lane.b32.xlu0 %v437_v19, %s1286_s14  ;;  %439 = vrot.lane.b32.xlu2 %v436_v20, %s1286_s14  ;;  %v452_v24 = vunpack.c.l.b16 %v329_v21  ;;  %v328_v25 = vpack.c.bf16 %v323_v23, %v322_v22  ;;  %341 = vst [vmem:[#allocation1] ss:$2 sm:$0xff] %v337_v12  ;;  %v225_v22 = vpack.c.bf16 %v1389_v15, %v1387_v14 }
  0xdb   : > { %v455_v26 = vpack.c.b16 %v452_v24, %v452_v24  ;;  %v451_v27 = vunpack.c.h.b16 %v328_v25  ;;  %v450_v10 = vunpack.c.l.b16 %v328_v25 }
  0xdd   : > { %v454_v29 = vpack.c.b16 %v451_v27, %v451_v27  ;;  %v453_v30 = vpack.c.b16 %v450_v10, %v450_v10  ;;  %v353_v27 = vunpack.c.l.b16 %v225_v22 }
  0xde   : > { %v346_v28 = vld.sshfl [vmem:[#allocation1 + $0x10] sm:$0xff pattern:$0x75316420] }
  0xdf   : > { %460 = vrot.lane.b32.xlu1 %v455_v26, %s1287_s20  ;;  %v351_v31 = vpack.c.bf16 %v346_v28, %v346_v28 }
  0xe0   : > { %v344_v32 = vld.sshfl [vmem:[#allocation1] sm:$0xff pattern:$0x75316420]  ;;  %v345_v33 = vld.sshfl [vmem:[#allocation1 + $0x8] sm:$0xff pattern:$0x75316420] }
  0xe1   : > { %458 = vrot.lane.b32.xlu0 %v454_v29, %s1287_s20  ;;  %456 = vrot.lane.b32.xlu2 %v453_v30, %s1287_s20  ;;  %v486_v34 = vunpack.c.l.b16 %v351_v31  ;;  %v350_v35 = vpack.c.bf16 %v345_v33, %v344_v32  ;;  %359 = vst [vmem:[#allocation1 + $0x1] ss:$4 sm:$0xff] %v1380_v5  ;;  %v354_v29 = vunpack.c.h.b16 %v225_v22  ;;  %v1293_v33 = vmov 1.0  }
  0xe2   : > { %651 = vmatpush.msra.mxu3 %v1293_v33  ;;  %1121 = vmatpush.msra.mxu2 %v1293_v33 }
  0xe3   : > { %v489_v36 = vpack.c.b16 %v486_v34, %v486_v34  ;;  %v485_v37 = vunpack.c.h.b16 %v350_v35  ;;  %v484_v38 = vunpack.c.l.b16 %v350_v35 }
  0xe4   : > { %652 = vmatpush.msra.mxu3 %v1293_v33  ;;  %1122 = vmatpush.msra.mxu2 %v1293_v33 }
  0xe5   : > { %v488_v39 = vpack.c.b16 %v485_v37, %v485_v37  ;;  %v487_v40 = vpack.c.b16 %v484_v38, %v484_v38  ;;  %v355_v38 = vpack.c.b16 %v353_v27, %v353_v27 }
  0xe6   : > { %653 = vmatpush.msra.mxu3 %v1293_v33  ;;  %1123 = vmatpush.msra.mxu2 %v1293_v33 }
  0xe7   : > { %494 = vrot.lane.b32.xlu1 %v489_v36, %s1288_s22 }
  0xe8   : > { %v364_v41 = vld.sshfl [vmem:[#allocation1 + $0x10] sm:$0xff pattern:$0x73625140]  ;;  %v362_v42 = vld.sshfl [vmem:[#allocation1 + $0x8] sm:$0xff pattern:$0x73625140]  ;;  %654 = vmatpush.msra.mxu3 %v1293_v33  ;;  %1124 = vmatpush.msra.mxu2 %v1293_v33 }
  0xe9   : > { %492 = vrot.lane.b32.xlu0 %v488_v39, %s1288_s22  ;;  %490 = vrot.lane.b32.xlu2 %v487_v40, %s1288_s22  ;;  %v360_v43 = vld.sshfl [vmem:[#allocation1] sm:$0xff pattern:$0x73625140]  ;;  %v356_v39 = vpack.c.b16 %v354_v29, %v354_v29  ;;  %s1236_s22 = scalar_lea.hbm %s1688_s4, 128 }
  0xea   : > { %412 = vst [vmem:[#allocation1] ss:$4 sm:$0xff] %v1380_v5  ;;  %655 = vmatpush.msra.mxu3 %v1293_v33  ;;  %1125 = vmatpush.msra.mxu2 %v1293_v33  ;;  %p1238_p1 = scmp.lt.s32.totalorder %s1236_s22, %s1232_s12 }
  0xec   : > { %656 = vmatpush.msra.mxu3 %v1293_v33  ;;  %1126 = vmatpush.msra.mxu2 %v1293_v33  ;;  %p1239_p2 = por %p1238_p1, %p1237_p0 }
  0xee   : > { %657 = vmatpush.msra.mxu3 %v1293_v33  ;;  %1127 = vmatpush.msra.mxu2 %v1293_v33  ;;  %p1240_p3 = pnand %p1239_p2, %p1235_p13 }
  0xef   : > { %370 = vrot.lane.b32.xlu1 %v364_v41, %s1289_s23 }
  0xf0   : > { %658 = vmatpush.msra.mxu3 %v1293_v33  ;;  %1128 = vmatpush.msra.mxu2 %v1293_v33 }
  0xf1   : > { %368 = vrot.lane.b32.xlu0 %v362_v42, %s1289_s23  ;;  %366 = vrot.lane.b32.xlu2 %v360_v43, %s1289_s23  ;;  %v417_v44 = vld.sshfl [vmem:[#allocation1 + $0x10] sm:$0xff pattern:$0x73625140]  ;;  %v415_v45 = vld.sshfl [vmem:[#allocation1 + $0x8] sm:$0xff pattern:$0x73625140] }
  0xf2   : > { %v413_v46 = vld.sshfl [vmem:[#allocation1] sm:$0xff pattern:$0x73625140]  ;;  %659 = vmatpush.msra.mxu3 %v1293_v33  ;;  %1129 = vmatpush.msra.mxu2 %v1293_v33 }
  0xf3   : > { %466 = vst [vmem:[#allocation1 + $0x3] ss:$4 sm:$0xff] %v1380_v5  ;;  %v399_v5 = vpack.c.b16 %v396_v49, %v396_v49 }
  0xf4   : > { %660 = vmatpush.msra.mxu3 %v1293_v33  ;;  %1130 = vmatpush.msra.mxu2 %v1293_v33 }
  0xf5   : > { %v402_v60 = vrot.slane %v399_v5, 2 }
  0xf6   : > { %661 = vmatpush.msra.mxu3 %v1293_v33  ;;  %1131 = vmatpush.msra.mxu2 %v1293_v33 }
  0xf7   : > { %423 = vrot.lane.b32.xlu1 %v417_v44, %s1290_s27 }
  0xf8   : > { %662 = vmatpush.msra.mxu3 %v1293_v33  ;;  %1132 = vmatpush.msra.mxu2 %v1293_v33 }
  0xf9   : > { %421 = vrot.lane.b32.xlu0 %v415_v45, %s1290_s27  ;;  %419 = vrot.lane.b32.xlu2 %v413_v46, %s1290_s27 }
  0xfa   : > { %v471_v50 = vld.sshfl [vmem:[#allocation1 + $0x10] sm:$0xff pattern:$0x73625140]  ;;  %v469_v54 = vld.sshfl [vmem:[#allocation1 + $0x8] sm:$0xff pattern:$0x73625140]  ;;  %663 = vmatpush.msra.mxu3 %v1293_v33  ;;  %1133 = vmatpush.msra.mxu2 %v1293_v33 }
  0xfb   : > { %v467_v55 = vld.sshfl [vmem:[#allocation1] sm:$0xff pattern:$0x73625140] }
  0xfc   : > { %664 = vmatpush.msra.mxu3 %v1293_v33  ;;  %1134 = vmatpush.msra.mxu2 %v1293_v33 }
  0xfe   : > { %665 = vmatpush.msra.mxu3 %v1293_v33  ;;  %1135 = vmatpush.msra.mxu2 %v1293_v33 }
  0xff   : > { %477 = vrot.lane.b32.xlu1 %v471_v50, %s1291_s28 }
 0x100   : > { %666 = vmatpush.msra.mxu3 %v1293_v33  ;;  %1136 = vmatpush.msra.mxu2 %v1293_v33 }
 0x101   : > { %475 = vrot.lane.b32.xlu0 %v469_v54, %s1291_s28  ;;  %473 = vrot.lane.b32.xlu2 %v467_v55, %s1291_s28  ;;  %s1294_s28 = smov 1  }
 0x107   : > { %407 = vrot.lane.b32.xlu1 %v402_v60, %s1292_s29  ;;  %v1119_v60 = vld [vmem:[%s1685_s1 + $0x8] sm:$0xff] }
 0x109   : > { %405 = vrot.lane.b32.xlu0 %v401_v53, %s1292_s29  ;;  %403 = vrot.lane.b32.xlu2 %v400_v61, %s1292_s29 }
 0x121   : > { %v1420_v56 = vpop.permute.xlu2 %383 }
 0x133   : > { %v440_v57 = vpop.permute.xlu2 %439 }
 0x137   : > { %v1422_v62 = vpop.permute.xlu1 %387 }
 0x139   : > { %v1424_v63 = vpop.permute.xlu0 %385 }
 0x13a   : > { %v390_v47 = vsel %vm389_vm14, %v1420_v56, %v1424_v63  ;;  %v391_v48 = vsel %vm389_vm14, %v1424_v63, %v1422_v62 }
 0x13b   : > { %v457_v0 = vpop.permute.xlu2 %456 }
 0x143   : > { %v491_v4 = vpop.permute.xlu2 %490 }
 0x149   : > { %v444_v1 = vpop.permute.xlu1 %443 }
 0x14b   : > { %v442_v2 = vpop.permute.xlu0 %441  ;;  %v367_v12 = vpop.permute.xlu2 %366 }
 0x14c   : > { %v446_v25 = vsel %vm445_vm9, %v440_v57, %v442_v2  ;;  %v447_v26 = vsel %vm445_vm9, %v442_v2, %v444_v1 }
 0x151   : > { %v461_v3 = vpop.permute.xlu1 %460 }
 0x153   : > { %v459_v6 = vpop.permute.xlu0 %458  ;;  %v420_v19 = vpop.permute.xlu2 %419 }
 0x154   : > { %v463_v32 = vsel %vm462_vm10, %v457_v0, %v459_v6  ;;  %v464_v14 = vsel %vm462_vm10, %v459_v6, %v461_v3 }
 0x159   : > { %v495_v7 = vpop.permute.xlu1 %494 }
 0x15b   : > { %v493_v8 = vpop.permute.xlu0 %492  ;;  %v474_v28 = vpop.permute.xlu2 %473 }
 0x15c   : > { %v497_v9 = vsel %vm496_vm6, %v491_v4, %v493_v8  ;;  %v498_v11 = vsel %vm496_vm6, %v493_v8, %v495_v7 }
 0x15d   : > { %v555_v13 = vsel %vm499_vm7, %v497_v9, 0  ;;  %v558_v16 = vsel %vm499_vm7, %v498_v11, 0 }
 0x15e   : > { %565 = vmatpush.bf16.msra.mxu0 %v555_v13  ;;  %584 = vmatpush.bf16.msra.mxu1 %v558_v16 }
 0x161   : > { %v371_v17 = vpop.permute.xlu1 %370 }
 0x163   : > { %v369_v18 = vpop.permute.xlu0 %368  ;;  %v404_v49 = vpop.permute.xlu2 %403 }
 0x164   : > { %v373_v42 = vsel %vm372_vm13, %v367_v12, %v369_v18  ;;  %v374_v43 = vsel %vm372_vm13, %v369_v18, %v371_v17  ;;  %v1547_v12 = vld [vmem:[%s1687_s3] sm:$0xff] }
 0x165   : > { %v502_v44 = vsel %vm499_vm7, %v355_v38, %v373_v42  ;;  %v505_v45 = vsel %vm499_vm7, %v356_v39, %v374_v43  ;;  %v692_v13 = vmul.f32 256.0, %v1547_v12 }
 0x166   : > { %v507_v54 = vsel %vm215_vm0, %v502_v44, %v390_v47  ;;  %v509_v55 = vsel %vm215_vm0, %v505_v45, %v391_v48 }
 0x169   : > { %v424_v20 = vpop.permute.xlu1 %423 }
 0x16b   : > { %v422_v21 = vpop.permute.xlu0 %421 }
 0x16c   : > { %v426_v23 = vsel %vm425_vm8, %v420_v19, %v422_v21  ;;  %v427_v24 = vsel %vm425_vm8, %v422_v21, %v424_v20  ;;  %v1555_v20 = vld [vmem:[%s1687_s3 + $0x8] sm:$0xff] }
 0x16d   : > { %v519_v10 = vsel %vm499_vm7, %v426_v23, %v446_v25  ;;  %v522_v30 = vsel %vm499_vm7, %v427_v24, %v447_v26  ;;  %v693_v21 = vmul.f32 256.0, %v1555_v20  ;;  %v1563_v26 = vld [vmem:[%s1687_s3 + $0x10] sm:$0xff]  ;;  %v701_v38 = vmul.f32 2.0, %v1555_v20 }
 0x16e   : > { %v524_v34 = vsel %vm215_vm0, %v519_v10, %v463_v32  ;;  %v526_v37 = vsel %vm215_vm0, %v522_v30, %v464_v14  ;;  %v694_v27 = vmul.f32 256.0, %v1563_v26  ;;  %vm736_vm0 = vcmask 7168  }
 0x16f   : > { %v713_v47 = vmul.f32 %v693_v21, %v1555_v20 }
 0x171   : > { %v478_v31 = vpop.permute.xlu1 %477 }
 0x173   : > { %v476_v15 = vpop.permute.xlu0 %475 }
 0x174   : > { %v480_v35 = vsel %vm479_vm11, %v474_v28, %v476_v15  ;;  %v481_v36 = vsel %vm479_vm11, %v476_v15, %v478_v31  ;;  %v1569_v31 = vld [vmem:[%s1687_s3 + $0x18] sm:$0xff] }
 0x175   : > { %v528_v40 = vsel %vm510_vm12, %v524_v34, %v480_v35  ;;  %v531_v41 = vsel %vm510_vm12, %v526_v37, %v481_v36  ;;  %v695_v32 = vmul.f32 256.0, %v1569_v31  ;;  %v700_v37 = vmul.f32 2.0, %v1547_v12 }
 0x176   : > { %566 = vmatpush.bf16.msra.mxu0 %v528_v40  ;;  %585 = vmatpush.bf16.msra.mxu1 %v531_v41  ;;  %v712_v41 = vmul.f32 %v692_v13, %v1547_v12 }
 0x179   : > { %v408_v46 = vpop.permute.xlu1 %407 }
 0x17b   : > { %v406_v50 = vpop.permute.xlu0 %405 }
 0x17c   : > { %v410_v51 = vsel %vm409_vm15, %v404_v49, %v406_v50  ;;  %v411_v52 = vsel %vm409_vm15, %v406_v50, %v408_v46 }
 0x17d   : > { %v512_v5 = vsel %vm510_vm12, %v507_v54, %v410_v51  ;;  %v515_v58 = vsel %vm510_vm12, %v509_v55, %v411_v52  ;;  %v702_v55 = vmul.f32 2.0, %v1563_v26 }
 0x17e   : > { %567 = vmatpush.bf16.msra.mxu0 %v512_v5  ;;  %586 = vmatpush.bf16.msra.mxu1 %v515_v58  ;;  %v703_v5 = vmul.f32 2.0, %v1569_v31 }
 0x181   : > { %1097 = vmatmul.msk.bf16.vlgmr.msra.gmra.mxu0 %vm547_vm1, %v1118_v59  ;;  %1099 = vmatmul.msk.bf16.vlgmr.msra.gmra.mxu1 %vm547_vm1, %v1118_v59 }
 0x182   : > { %610 = vmatpush.msrb.mxu0 %v1293_v33 }
 0x184   : > { %611 = vmatpush.msrb.mxu0 %v1293_v33 }
 0x186   : > { %612 = vmatpush.msrb.mxu0 %v1293_v33 }
 0x188   : > { %613 = vmatpush.msrb.mxu0 %v1293_v33 }
 0x18a   : > { %614 = vmatpush.msrb.mxu0 %v1293_v33 }
 0x18c   : > { %615 = vmatpush.msrb.mxu0 %v1293_v33 }
 0x18e   : > { %616 = vmatpush.msrb.mxu0 %v1293_v33 }
 0x190   : > { %617 = vmatpush.msrb.mxu0 %v1293_v33 }
 0x191   : > { %1098 = vmatmul.msk.bf16.gmra.mxu0 %vm547_vm1, %v1119_v60  ;;  %1100 = vmatmul.msk.bf16.gmra.mxu1 %vm547_vm1, %v1119_v60  ;;  %v714_v60 = vmul.f32 %v694_v27, %v1563_v26 }
 0x192   : > { %618 = vmatpush.msrb.mxu0 %v1293_v33 }
 0x194   : > { %619 = vmatpush.msrb.mxu0 %v1293_v33 }
 0x196   : > { %620 = vmatpush.msrb.mxu0 %v1293_v33 }
 0x198   : > { %621 = vmatpush.msrb.mxu0 %v1293_v33 }
 0x19a   : > { %622 = vmatpush.msrb.mxu0 %v1293_v33 }
 0x19c   : > { %623 = vmatpush.msrb.mxu0 %v1293_v33 }
 0x19e   : > { %624 = vmatpush.msrb.mxu0 %v1293_v33 }
 0x1a0   : > { %625 = vmatpush.msrb.mxu0 %v1293_v33 }
 0x1fe   : > { %v1504_v53 = vpop.f32.mrf.mxu0  ;;  %v1506_v61 = vpop.f32.mrf.mxu1 }
 0x1ff   : > { %626 = vmatmul.f32.vlgmr.msrb.gmra.mxu0 %v1504_v53  ;;  %667 = vmatmul.f32.vlgmr.msra.gmra.mxu3 %v1506_v61  ;;  %v602_v2 = vmul.f32 %v1504_v53, %v1504_v53  ;;  %v603_v3 = vmul.f32 %v1506_v61, %v1506_v61 }
 0x206   : > { %v1510_v56 = vpop.f32.mrf.mxu0  ;;  %v1512_v57 = vpop.f32.mrf.mxu1 }
 0x207   : > { %629 = vmatmul.f32.vlgmr.msra.gmra.mxu2 %v1510_v56  ;;  %670 = vmatmul.f32.gmra.mxu3 %v1512_v57  ;;  %v604_v4 = vmul.f32 %v1510_v56, %v1510_v56  ;;  %v605_v6 = vmul.f32 %v1512_v57, %v1512_v57 }
 0x20e   : > { %v1516_v62 = vpop.f32.mrf.mxu0  ;;  %v1518_v63 = vpop.f32.mrf.mxu1 }
 0x20f   : > { %632 = vmatmul.f32.gmra.mxu2 %v1516_v62  ;;  %673 = vmatmul.f32.gmra.mxu3 %v1518_v63  ;;  %v606_v7 = vmul.f32 %v1516_v62, %v1516_v62  ;;  %v607_v8 = vmul.f32 %v1518_v63, %v1518_v63 }
 0x216   : > { %v1522_v0 = vpop.f32.mrf.mxu0  ;;  %v1524_v1 = vpop.f32.mrf.mxu1 }
 0x217   : > { %635 = vmatmul.f32.gmra.mxu2 %v1522_v0  ;;  %676 = vmatmul.f32.gmra.mxu3 %v1524_v1  ;;  %v608_v9 = vmul.f32 %v1522_v0, %v1522_v0  ;;  %v609_v11 = vmul.f32 %v1524_v1, %v1524_v1 }
 0x21f   : > { %638 = vmatmul.f32.gmra.mxu2 %v602_v2  ;;  %679 = vmatmul.f32.gmra.mxu3 %v603_v3 }
 0x227   : > { %641 = vmatmul.f32.gmra.mxu2 %v604_v4  ;;  %682 = vmatmul.f32.gmra.mxu3 %v605_v6 }
 0x22f   : > { %644 = vmatmul.f32.gmra.mxu2 %v606_v7  ;;  %685 = vmatmul.f32.gmra.mxu3 %v607_v8  ;;  %v715_v8 = vmul.f32 %v695_v32, %v1569_v31 }
 0x237   : > { %647 = vmatmul.f32.gmra.mxu2 %v608_v9  ;;  %688 = vmatmul.f32.gmra.mxu3 %v609_v11 }
 0x27c   : > { %v627_v16 = vpop.f32.mrf.mxu0 }
 0x282   : > { %v668_v17 = vpop.f32.mrf.mxu3 }
 0x283   : > { %v669_v18 = vadd.f32 %v668_v17, %v627_v16  ;;  %v741_v17 = vlaneseq }
 0x285   : > { %v1550_v19 = vadd.f32 %v692_v13, %v669_v18  ;;  %v704_v40 = vmul.f32 %v700_v37, %v669_v18  ;;  %v1582_v18 = vshrl.u32 %v741_v17, 7 }
 0x28a   : > { %v630_v22 = vpop.f32.mrf.mxu2  ;;  %v671_v23 = vpop.f32.mrf.mxu3 }
 0x28b   : > { %v672_v24 = vadd.f32 %v671_v23, %v630_v22 }
 0x28d   : > { %v1558_v25 = vadd.f32 %v693_v21, %v672_v24  ;;  %v705_v44 = vmul.f32 %v701_v38, %v672_v24  ;;  %v750_v21 = vadd.s32 1, %v1582_v18 }
 0x292   : > { %v633_v10 = vpop.f32.mrf.mxu2  ;;  %v674_v28 = vpop.f32.mrf.mxu3 }
 0x293   : > { %v675_v29 = vadd.f32 %v674_v28, %v633_v10  ;;  %v746_v10 = vmul.u32 2, %v1582_v18  ;;  %v752_v28 = vmul.u32 2, %v750_v21 }
 0x295   : > { %v698_v30 = vadd.f32 %v694_v27, %v675_v29  ;;  %v706_v59 = vmul.f32 %v702_v55, %v675_v29  ;;  %v745_v27 = vand.u32 127, %v741_v17  ;;  %v1587_v29 = vadd.s32 8, %v1582_v18 }
 0x297   : > { %vm748_vm3 = vcmp.ge.s32.totalorder %v745_v27, %v746_v10  ;;  %vm754_vm5 = vcmp.lt.s32.totalorder %v745_v27, %v752_v28  ;;  %v747_v37 = vmul.u32 2, %v1587_v29  ;;  %v763_v28 = vadd.s32 24, %v1582_v18 }
 0x298   : > { %vm756_vm6 = vmand %vm748_vm3, %vm754_vm5 }
 0x299   : > { %vm749_vm7 = vcmp.ge.s32.totalorder %v745_v27, %v747_v37 }
 0x29a   : > { %v636_v33 = vpop.f32.mrf.mxu2  ;;  %v677_v14 = vpop.f32.mrf.mxu3 }
 0x29b   : > { %v678_v15 = vadd.f32 %v677_v14, %v636_v33  ;;  %v751_v14 = vadd.s32 1, %v1587_v29 }
 0x29d   : > { %v699_v34 = vadd.f32 %v695_v32, %v678_v15  ;;  %v707_v4 = vmul.f32 %v703_v5, %v678_v15  ;;  %v753_v38 = vmul.u32 2, %v751_v14 }
 0x29f   : > { %vm755_vm8 = vcmp.lt.s32.totalorder %v745_v27, %v753_v38 }
 0x2a0   : > { %vm757_vm9 = vmand %vm749_vm7, %vm755_vm8 }
 0x2a2   : > { %v639_v35 = vpop.f32.mrf.mxu2  ;;  %v680_v36 = vpop.f32.mrf.mxu3 }
 0x2a3   : > { %v681_v39 = vadd.f32 %v680_v36, %v639_v35 }
 0x2a5   : > { %v708_v45 = vadd.f32 %v704_v40, %v681_v39 }
 0x2a7   : > { %v716_v49 = vadd.f32 %v712_v41, %v708_v45 }
 0x2aa   : > { %v642_v42 = vpop.f32.mrf.mxu2  ;;  %v683_v43 = vpop.f32.mrf.mxu3 }
 0x2ab   : > { %v684_v46 = vadd.f32 %v683_v43, %v642_v42 }
 0x2ad   : > { %v709_v48 = vadd.f32 %v705_v44, %v684_v46 }
 0x2af   : > { %v717_v50 = vadd.f32 %v713_v47, %v709_v48 }
 0x2b1   : > { %v1201_v51 = vpack.i.bf16 %v716_v49, %v717_v50 }
 0x2b2   : > { %v645_v52 = vpop.f32.mrf.mxu2  ;;  %v686_v54 = vpop.f32.mrf.mxu3 }
 0x2b3   : > { %1202 = vrot.lane.b32.xlu0 %v1201_v51, %s1294_s28  ;;  %v687_v58 = vadd.f32 %v686_v54, %v645_v52 }
 0x2b5   : > { %v710_v6 = vadd.f32 %v706_v59, %v687_v58  ;;  %v769_v59 = vadd.s32 1, %v745_v27 }
 0x2b7   : > { %v718_v11 = vadd.f32 %v714_v60, %v710_v6  ;;  %v770_v6 = vmul.u32 2, %v769_v59 }
 0x2b9   : > { %vm771_vm11 = vcmp.lt.s32.totalorder %v1582_v18, %v770_v6 }
 0x2ba   : > { %v648_v2 = vpop.f32.mrf.mxu2  ;;  %v689_v3 = vpop.f32.mrf.mxu3 }
 0x2bb   : > { %v690_v7 = vadd.f32 %v689_v3, %v648_v2 }
 0x2bd   : > { %v711_v9 = vadd.f32 %v707_v4, %v690_v7  ;;  %v764_v4 = vmul.u32 2, %v745_v27  ;;  %v762_v27 = vadd.s32 16, %v1582_v18 }
 0x2bf   : > { %v719_v13 = vadd.f32 %v715_v8, %v711_v9  ;;  %vm765_vm10 = vcmp.ge.s32.totalorder %v1582_v18, %v764_v4  ;;  %vm766_vm5 = vcmp.ge.s32.totalorder %v1587_v29, %v764_v4  ;;  %vm767_vm8 = vcmp.ge.s32.totalorder %v762_v27, %v764_v4 }
 0x2c0   : > { %vm775_vm1 = vmand %vm765_vm10, %vm771_vm11  ;;  %vm774_vm10 = vcmp.lt.s32.totalorder %v763_v28, %v770_v6 }
 0x2c1   : > { %v1196_v16 = vpack.i.bf16 %v718_v11, %v719_v13 }
 0x2c3   : > { %1197 = vrot.lane.b32.xlu2 %v1196_v16, %s1294_s28 }
 0x31d   : > { %v1198_v22 = vpop.permute.xlu2 %1197 }
 0x31e   : > { %v1200_v23 = vunpack.i.h.bf16 %v1198_v22  ;;  %v1199_v24 = vunpack.i.l.bf16 %v1198_v22 }
 0x320   : > { %v740_v32 = vsel %vm736_vm0, %v699_v34, %v1199_v24  ;;  %v739_v33 = vsel %vm736_vm0, %v698_v30, %v1200_v23  ;;  %v1295_v34 = vmov 0.0  }
 0x321   : > { %805 = vmatpush.msra.mxu0 %v740_v32  ;;  %v1101_v40 = vsel %vm756_vm6, 1.0, %v1295_v34  ;;  %v1102_v41 = vsel %vm757_vm9, 1.0, %v1295_v34  ;;  %v1103_v23 = vsel %vm775_vm1, 1.0, %v1295_v34  ;;  %vm772_vm6 = vcmp.lt.s32.totalorder %v1587_v29, %v770_v6 }
 0x322   : > { %vm776_vm7 = vmand %vm766_vm5, %vm772_vm6  ;;  %vm773_vm9 = vcmp.lt.s32.totalorder %v762_v27, %v770_v6 }
 0x323   : > { %806 = vmatpush.msra.mxu0 %v739_v33  ;;  %v1104_v10 = vsel %vm776_vm7, 1.0, %v1295_v34  ;;  %v1296_v33 = vmov 1  }
 0x324   : > { %1208 = vset.pattern.permute.xlu1 %v1296_v33  ;;  %1206 = vset.pattern.permute.xlu2 %v1296_v33 }
 0x325   : > { %v1203_v15 = vpop.permute.xlu0 %1202  ;;  %1207 = vset.pattern.permute.xlu0 %v1296_v33 }
 0x326   : > { %v1205_v35 = vunpack.i.h.bf16 %v1203_v15  ;;  %v1204_v36 = vunpack.i.l.bf16 %v1203_v15 }
 0x328   : > { %v738_v39 = vsel %vm736_vm0, %v1558_v25, %v1204_v36  ;;  %v737_v30 = vsel %vm736_vm0, %v1550_v19, %v1205_v35 }
 0x329   : > { %807 = vmatpush.msra.mxu0 %v738_v39 }
 0x32b   : > { %808 = vmatpush.msra.mxu0 %v737_v30 }
 0x32c   : > { %1107 = vmatmul.msk.f32.vlgmr.msra.gmra.mxu0 %vm311_vm4, %v1101_v40 }
 0x334   : > { %1108 = vmatmul.msk.f32.gmra.mxu0 %vm311_vm4, %v1102_v41 }
 0x3a9   : > { %v810_v42 = vpop.f32.mrf.mxu0 }
 0x3aa   : > { %v816_v43 = vmul.f32 0.001953125, %v810_v42 }
 0x3ac   : > { %v818_v25 = vmul.f32 %v816_v43, %v816_v43 }
 0x3ae   : > { %822 = vrot.lane.b32.xlu2 %v818_v25, %s1294_s28 }
 0x3b1   : > { %v813_v44 = vpop.f32.mrf.mxu0 }
 0x3b2   : > { %v817_v45 = vmul.f32 0.001953125, %v813_v44 }
 0x3b4   : > { %v819_v46 = vmul.f32 %v817_v45, %v817_v45 }
 0x3b6   : > { %824 = vrot.lane.b32.xlu1 %v819_v46, %s1294_s28 }
 0x3be   : > { %929 = vrot.lane.b32.xlu1 %v1547_v12, %s1285_s13 }
 0x408   : > { %v823_v19 = vpop.permute.xlu2 %822 }
 0x409   : > { %v828_v47 = vsub.f32 %v816_v43, %v823_v19 }
 0x40b   : > { %v830_v48 = vmax.f32 %v828_v47, 0.0 }
 0x40d   : > { %v832_v49 = vadd.f32 1e-05, %v830_v48 }
 0x40f   : > { %1212 = vrsqrt.f32 %v832_v49  ;;  %vm840_vm13 = vweird.f32 %v832_v49 }
 0x415   : > { %v1213_v51 = vpop.eup %1212 }
 0x416   : > { %v835_v55 = vmul.f32 %v1213_v51, %v832_v49  ;;  %vm841_vm4 = vweird.f32 %v1213_v51 }
 0x417   : > { %vm842_vm14 = vmor %vm840_vm13, %vm841_vm4 }
 0x418   : > { %v836_v58 = vmul.f32 %v1213_v51, %v835_v55  ;;  %vm777_vm4 = vmand %vm767_vm8, %vm773_vm9 }
 0x419   : > { %v1105_v32 = vsel %vm777_vm4, 1.0, %v1295_v34 }
 0x41a   : > { %v837_v60 = vmul.f32 0.5, %v836_v58 }
 0x41c   : > { %v838_v7 = vsub.f32 1.5, %v837_v60 }
 0x41e   : > { %v839_v13 = vmul.f32 %v1213_v51, %v838_v7 }
 0x420   : > { %v843_v21 = vsel %vm842_vm14, %v1213_v51, %v839_v13 }
 0x421   : > { %v854_v24 = vsel %vm736_vm0, %v816_v43, %v843_v21 }
 0x428   : > { %v825_v50 = vpop.permute.xlu1 %824 }
 0x429   : > { %v829_v52 = vsub.f32 %v817_v45, %v825_v50 }
 0x42b   : > { %v831_v54 = vmax.f32 %v829_v52, 0.0 }
 0x42d   : > { %v833_v5 = vadd.f32 1e-05, %v831_v54 }
 0x42f   : > { %1214 = vrsqrt.f32 %v833_v5  ;;  %vm850_vm15 = vweird.f32 %v833_v5 }
 0x430   : > { %v930_v40 = vpop.permute.xlu1 %929 }
 0x435   : > { %v1215_v2 = vpop.eup %1214 }
 0x436   : > { %v845_v3 = vmul.f32 %v1215_v2, %v833_v5  ;;  %vm851_vm12 = vweird.f32 %v1215_v2 }
 0x437   : > { %vm852_vm3 = vmor %vm850_vm15, %vm851_vm12 }
 0x438   : > { %v846_v8 = vmul.f32 %v1215_v2, %v845_v3 }
 0x43a   : > { %v847_v9 = vmul.f32 0.5, %v846_v8 }
 0x43c   : > { %v848_v11 = vsub.f32 1.5, %v847_v9 }
 0x43e   : > { %v849_v16 = vmul.f32 %v1215_v2, %v848_v11 }
 0x440   : > { %v853_v17 = vsel %vm852_vm3, %v1215_v2, %v849_v16 }
 0x441   : > { %v855_v22 = vsel %vm736_vm0, %v817_v45, %v853_v17  ;;  %vm768_vm0 = vcmp.ge.s32.totalorder %v763_v28, %v764_v4 }
 0x442   : > { %882 = vmatpush.msrb.mxu1 %v855_v22  ;;  %vm778_vm11 = vmand %vm768_vm0, %vm774_vm10 }
 0x443   : > { %v1106_v29 = vsel %vm778_vm11, 1.0, %v1295_v34  ;;  %v1297_v34 = vmov 0  }
 0x444   : > { %883 = vmatpush.msrb.mxu1 %v854_v24 }
 0x445   : > { %1109 = vmatmul.msk.f32.vlgmr.msrb.gmra.mxu1 %vm267_vm2, %v1103_v23 }
 0x44d   : > { %1110 = vmatmul.msk.f32.gmra.mxu1 %vm267_vm2, %v1104_v10 }
 0x455   : > { %1111 = vmatmul.msk.f32.gmra.mxu1 %vm267_vm2, %v1105_v32 }
 0x45d   : > { %1112 = vmatmul.msk.f32.gmra.mxu1 %vm267_vm2, %v1106_v29 }
 0x4c2   : > { %v885_v14 = vpop.f32.mrf.mxu1 }
 0x4c3   : > { %v897_v15 = vmul.f32 %v885_v14, %v1547_v12  ;;  %v901_v30 = vsub.f32 %v1547_v12, %v885_v14 }
 0x4c5   : > { %909 = vrot.lane.b32.xlu0 %v897_v15, %s1289_s23 }
 0x4ca   : > { %v888_v18 = vpop.f32.mrf.mxu1 }
 0x4cb   : > { %v898_v35 = vmul.f32 %v888_v18, %v1555_v20  ;;  %v902_v44 = vsub.f32 %v1555_v20, %v888_v18 }
 0x4cd   : > { %911 = vrot.lane.b32.xlu1 %v898_v35, %s1289_s23 }
 0x4d2   : > { %v891_v36 = vpop.f32.mrf.mxu1 }
 0x4d3   : > { %v899_v37 = vmul.f32 %v891_v36, %v1563_v26  ;;  %v903_v52 = vsub.f32 %v1563_v26, %v891_v36 }
 0x4d5   : > { %935 = vrot.lane.b32.xlu1 %v1569_v31, %s1285_s13  ;;  %913 = vrot.lane.b32.xlu2 %v899_v37, %s1289_s23 }
 0x4da   : > { %v894_v38 = vpop.f32.mrf.mxu1 }
 0x4db   : > { %v900_v39 = vmul.f32 %v894_v38, %v1569_v31  ;;  %v904_v48 = vsub.f32 %v1569_v31, %v894_v38 }
 0x4dd   : > { %954 = vperm.xlu1 %1208, %v899_v37   ;;  %931 = vrot.lane.b32.xlu2 %v1555_v20, %s1285_s13 }
 0x4de   : > { %915 = vrot.lane.b32.xlu0 %v900_v39, %s1289_s23 }
 0x4e5   : > { %946 = vperm.xlu2 %1206, %v897_v15   ;;  %1209 = vset.pattern.permute.xlu1 %v1297_v34 }
 0x4e6   : > { %933 = vrot.lane.b32.xlu0 %v1563_v26, %s1285_s13  ;;  %s188_s13 = sand.u32 1, %s1270_s16  }
 0x4e7   : > { %s1087_s23 = sshll.u32 %s188_s13, 6  ;;  %s1006_s19 = scalar_lea.sflag [#allocation3], %s188_s13 }
 0x4e8   : > { %s190_s29 = scalar_lea.vmem [#allocation2], %s1087_s23 }
 0x4e9   : > { %s1018_s8 = sshll.u32 %s190_s29, 4  ;;  %s1019_s8 = int_to_ptr.vmem [resolvable:$true] %s1018_s8 }
 0x4ed   : > { %958 = vperm.xlu2 %1206, %v900_v39  }
 0x4ee   : > { %950 = vperm.xlu0 %1207, %v898_v35  }
 0x4f5   : > { %1210 = vset.pattern.permute.xlu2 %v1297_v34 }
 0x4f6   : > { %1211 = vset.pattern.permute.xlu0 %v1297_v34 }
 0x52f   : > { %v914_v41 = vpop.permute.xlu2 %913 }
 0x530   : > { %v923_v54 = vmul.f32 %v914_v41, %v903_v52 }
 0x537   : > { %v910_v42 = vpop.permute.xlu0 %909  ;;  %v932_v19 = vpop.permute.xlu2 %931 }
 0x538   : > { %v921_v43 = vmul.f32 %v910_v42, %v901_v30 }
 0x53a   : > { %v941_v25 = vadd.f32 %v930_v40, %v921_v43 }
 0x53c   : > { %971 = vperm.xlu1 %1209, %v941_v25  }
 0x53f   : > { %v912_v45 = vpop.permute.xlu1 %911  ;;  %v947_v20 = vpop.permute.xlu2 %946 }
 0x540   : > { %v922_v46 = vmul.f32 %v912_v45, %v902_v44  ;;  %v961_v6 = vmul.f32 %v947_v20, %v1504_v53  ;;  %v962_v7 = vmul.f32 %v947_v20, %v1506_v61 }
 0x542   : > { %v942_v47 = vadd.f32 %v932_v19, %v922_v46 }
 0x544   : > { %976 = vperm.xlu2 %1210, %v942_v47  }
 0x547   : > { %v936_v51 = vpop.permute.xlu1 %935  ;;  %v959_v58 = vpop.permute.xlu2 %958 }
 0x54f   : > { %v955_v26 = vpop.permute.xlu1 %954 }
 0x550   : > { %v916_v49 = vpop.permute.xlu0 %915  ;;  %v965_v53 = vmul.f32 %v955_v26, %v1516_v62  ;;  %v966_v61 = vmul.f32 %v955_v26, %v1518_v63 }
 0x551   : > { %v924_v50 = vmul.f32 %v916_v49, %v904_v48 }
 0x553   : > { %v944_v12 = vadd.f32 %v936_v51, %v924_v50 }
 0x555   : > { %986 = vperm.xlu1 %1209, %v944_v12  }
 0x558   : > { %v934_v55 = vpop.permute.xlu0 %933 }
 0x559   : > { %v943_v5 = vadd.f32 %v934_v55, %v923_v54 }
 0x55b   : > { %981 = vperm.xlu0 %1211, %v943_v5  }
 0x560   : > { %v951_v59 = vpop.permute.xlu0 %950 }
 0x561   : > { %v963_v60 = vmul.f32 %v951_v59, %v1510_v56  ;;  %v964_v31 = vmul.f32 %v951_v59, %v1512_v57  ;;  %v967_v56 = vmul.f32 %v959_v58, %v1522_v0  ;;  %v968_v57 = vmul.f32 %v959_v58, %v1524_v1 }
 0x59e   : > { %v977_v2 = vpop.permute.xlu2 %976 }
 0x59f   : > { %v991_v3 = vadd.f32 %v977_v2, %v963_v60  ;;  %v992_v4 = vadd.f32 %v977_v2, %v964_v31 }
 0x5a1   : > { %999 = vst [vmem:[%s190_s29 + $0x10] sm:$0xff] %v991_v3 }
 0x5a2   : > { %1000 = vst [vmem:[%s190_s29 + $0x18] sm:$0xff] %v992_v4 }
 0x5ae   : > { %v972_v8 = vpop.permute.xlu1 %971 }
 0x5af   : > { %v989_v9 = vadd.f32 %v972_v8, %v961_v6  ;;  %v990_v11 = vadd.f32 %v972_v8, %v962_v7 }
 0x5b1   : > { %997 = vst [vmem:[%s190_s29] sm:$0xff] %v989_v9 }
 0x5b2   : > { %998 = vst [vmem:[%s190_s29 + $0x8] sm:$0xff] %v990_v11 }
 0x5c7   : > { %v987_v13 = vpop.permute.xlu1 %986 }
 0x5c8   : > { %v995_v16 = vadd.f32 %v987_v13, %v967_v56  ;;  %v996_v17 = vadd.f32 %v987_v13, %v968_v57 }
 0x5ca   : > { %1003 = vst [vmem:[%s190_s29 + $0x30] sm:$0xff] %v995_v16 }
 0x5cb   : > { %1004 = vst [vmem:[%s190_s29 + $0x38] sm:$0xff] %v996_v17 }
 0x5cd   : > { %v982_v0 = vpop.permute.xlu0 %981 }
 0x5ce   : > { %v993_v1 = vadd.f32 %v982_v0, %v965_v53  ;;  %v994_v21 = vadd.f32 %v982_v0, %v966_v61 }
 0x5d0   : > { %1001 = vst [vmem:[%s190_s29 + $0x20] sm:$0xff] %v993_v1 }
 0x5d1   : > { %1002 = vst [vmem:[%s190_s29 + $0x28] sm:$0xff] %v994_v21 }
 0x5d2   : > { %1243 = shalt.err (!%p1240_p3)
}
 0x5d3   : > { %s1298_s13 = smov 256  }
 0x5d4   : > { %1138 = dma.vmem_to_hbm [thread:$0]  (%p1362_p5), %s1019_s8, 1024, %s1021_s9, %s1006_s19, %s1298_s13, %s1298_s13, %s1283_s11  }
 0x5d5 PF: > { %p1144_p4 = scmp.ge.s32.totalorder %s1278_s18, 2  ;;  %s1035_s23 = sand.u32 1, %s1266_s15  }
 0x5d6   : > { %s1036_s29 = scalar_lea.sflag [#allocation3], %s1035_s23 }
 0x5d7   : > { %p1141_p7 = pnand %p1144_p4, %p1366_p6 }
 0x5d9   : > { %p1142_p8 = pneg %p1141_p7 }
 0x5db   : > { %1261 = dma.done.wait (%p1142_p8), %s1036_s29, 1024  }
 0x5dc   : > { %1263 = vsyncadd (%p1142_p8), %s1036_s29, 4294966272  ;;  %p14_p9 = scmp.ge.s32.totalorder %s1349_s21, 4   ;;  %s1691_s15 = smov %s1270_s16 }
 0x5dd   : > { %s1692_s16 = smov %s1274_s17  ;;  %s1693_s17 = smov %s1360_s24 }
 0x5de   : > { %s1694_s18 = smov %s1349_s21  ;;  %16 = sbr.rel (!%p14_p9) target bundleno = 3 (0x3), region = 78 }
 0x5e3   :  { %1042 = vsyncpa [#allocation3], 1 }
 0x5e4   :  { %1044 = vsyncpa [#allocation3 + $0x1], 1 }

</bundles_post_ra>
